<compile_context>
chip_gen: v5e
topology: v5e:2x2
jax: 0.10.0
libtpu: 0.0.40
codegen_flags: <defaults>
</compile_context>

<pallas_src>
import functools

import jax
import jax.numpy as jnp
from jax.experimental import pallas as pl
from jax.experimental.pallas import tpu as pltpu


def _contrastive_loss_kernel(p1r_ref, p2r_ref, p1c_ref, p2c_ref, loss_ref,
                             acc_top, acc_bot, *, temperature, use_bf16_matmul):
    inv_t = 1.0 / temperature
    c = pl.program_id(1)
    n_c = pl.num_programs(1)

    def l2_normalize(x):
        ss = jnp.sum(x * x, axis=1, keepdims=True)
        # == x / max(||x||, 1e-12)  (torch F.normalize semantics), via rsqrt
        return x * jax.lax.rsqrt(jnp.maximum(ss, 1e-24))

    z1r = l2_normalize(p1r_ref[...].astype(jnp.float32))   # (tm, D) rows of z_i
    z2r = l2_normalize(p2r_ref[...].astype(jnp.float32))   # (tm, D) rows of z_j
    z1c = l2_normalize(p1c_ref[...].astype(jnp.float32))   # (tn, D) cols of z_i
    z2c = l2_normalize(p2c_ref[...].astype(jnp.float32))   # (tn, D) cols of z_j

    if use_bf16_matmul:
        m1r, m2r = z1r.astype(jnp.bfloat16), z2r.astype(jnp.bfloat16)
        m1c, m2c = z1c.astype(jnp.bfloat16), z2c.astype(jnp.bfloat16)
    else:
        m1r, m2r, m1c, m2c = z1r, z2r, z1c, z2c

    dot = functools.partial(
        jax.lax.dot_general,
        dimension_numbers=(((1,), (1,)), ((), ())),   # contract on D, no .T operand
        preferred_element_type=jnp.float32)

    # exp(cosine / T) of this (row-tile x col-tile) block against [z_i ; z_j]
    e_top = jnp.exp(dot(m1r, m1c) * inv_t) + jnp.exp(dot(m1r, m2c) * inv_t)
    e_bot = jnp.exp(dot(m2r, m1c) * inv_t) + jnp.exp(dot(m2r, m2c) * inv_t)

    @pl.when(c == 0)
    def _():
        acc_top[...] = jnp.zeros_like(acc_top)
        acc_bot[...] = jnp.zeros_like(acc_bot)

    acc_top[...] += jnp.sum(e_top, axis=1, keepdims=True)
    acc_bot[...] += jnp.sum(e_bot, axis=1, keepdims=True)

    @pl.when(c == n_c - 1)
    def _():
        # positives: cos(z_i[r], z_j[r]) as a row-wise dot — no diag extraction.
        pos = jnp.sum(z1r * z2r, axis=1, keepdims=True)
        # remove the self-similarity term (exactly the ~eye mask of the
        # reference; == 1 for non-degenerate rows) accumulated in the
        # diagonal block.
        self_i = jnp.sum(z1r * z1r, axis=1, keepdims=True)
        self_j = jnp.sum(z2r * z2r, axis=1, keepdims=True)
        denom_top = acc_top[...] - jnp.exp(self_i * inv_t)
        denom_bot = acc_bot[...] - jnp.exp(self_j * inv_t)
        # -log(exp(pos/T)/denom_top) - log(exp(pos/T)/denom_bot)
        loss_ref[...] = (jnp.log(denom_top) + jnp.log(denom_bot)
                         - 2.0 * pos * inv_t)


def _pick_tile(b, target):
    """Largest tile <= target that divides b and keeps (8,128) layout legal."""
    if b <= target:
        return b
    for t in range(target, 0, -1):
        if b % t == 0 and (t % 8 == 0):
            return t
    return b  # fall back to a single (full-extent) block


def contrastive_loss(proj_1, proj_2, temperature=0.5, *,
                     row_tile=256, col_tile=512, use_bf16_matmul=False):
    """Pallas TPU implementation of the PyTorch ContrastiveLoss.forward."""
    assert proj_1.shape == proj_2.shape and proj_1.ndim == 2
    b, d = proj_1.shape
    # row_tile >= 256 keeps the MXU M-dim filled on v6e/v7x (128 on v5e);
    # tiles are capped so per-step VMEM stays well under the v7x 64 MiB limit.
    tm = _pick_tile(b, row_tile)
    tn = _pick_tile(b, col_tile)
    n_r, n_c = b // tm, b // tn

    kernel = functools.partial(_contrastive_loss_kernel,
                               temperature=float(temperature),
                               use_bf16_matmul=use_bf16_matmul)

    per_row = pl.pallas_call(
        kernel,
        out_shape=jax.ShapeDtypeStruct((b, 1), jnp.float32),
        grid=(n_r, n_c),
        in_specs=[
            pl.BlockSpec((tm, d), lambda r, c: (r, 0)),   # z_i row tile
            pl.BlockSpec((tm, d), lambda r, c: (r, 0)),   # z_j row tile
            pl.BlockSpec((tn, d), lambda r, c: (c, 0)),   # z_i col tile
            pl.BlockSpec((tn, d), lambda r, c: (c, 0)),   # z_j col tile
        ],
        out_specs=pl.BlockSpec((tm, 1), lambda r, c: (r, 0)),
        scratch_shapes=[
            pltpu.VMEM((tm, 1), jnp.float32),   # denom accumulator (top half)
            pltpu.VMEM((tm, 1), jnp.float32),   # denom accumulator (bottom half)
        ],
        compiler_params=pltpu.CompilerParams(
            dimension_semantics=("parallel", "arbitrary")),
    )(proj_1, proj_2, proj_1, proj_2)

    # per_row[r] = loss of row r of z_i + loss of row r of z_j; final mean over
    # the 2B losses is a trivial B-element reduction in the wrapper.
    return jnp.sum(per_row) / (2.0 * b)


def _reference_loss(proj_1, proj_2, temperature=0.5):
    """Pure-JAX reference mirroring the PyTorch code, for verification."""
    b = proj_1.shape[0]
    z_i = proj_1 / jnp.maximum(jnp.linalg.norm(proj_1, axis=1, keepdims=True), 1e-12)
    z_j = proj_2 / jnp.maximum(jnp.linalg.norm(proj_2, axis=1, keepdims=True), 1e-12)
    reps = jnp.concatenate([z_i, z_j], axis=0)
    sim = reps @ reps.T
    sim_ij = jnp.diagonal(sim, offset=b)
    sim_ji = jnp.diagonal(sim, offset=-b)
    positives = jnp.concatenate([sim_ij, sim_ji], axis=0)
    nominator = jnp.exp(positives / temperature)
    mask = (~jnp.eye(2 * b, dtype=bool)).astype(jnp.float32)
    denominator = mask * jnp.exp(sim / temperature)
    all_losses = -jnp.log(nominator / jnp.sum(denominator, axis=1))
    return jnp.sum(all_losses) / (2 * b)


if __name__ == "__main__":
    key = jax.random.PRNGKey(0)
    k1, k2 = jax.random.split(key)
    batch, embedding_dim = 8, 128
    proj_1 = jax.random.normal(k1, (batch, embedding_dim), dtype=jnp.float32)
    proj_2 = jax.random.normal(k2, (batch, embedding_dim), dtype=jnp.float32)

    loss = contrastive_loss(proj_1, proj_2, temperature=0.5)
    jax.block_until_ready(loss)

    ref = _reference_loss(proj_1, proj_2, temperature=0.5)
    assert jnp.allclose(loss, ref, rtol=1e-5, atol=1e-5), (loss, ref)
    print("KERNEL_OK")
</pallas_src>

<mosaic_0001>
module attributes {stable_mosaic.version = 11 : i64} {
  func.func @_contrastive_loss_kernel(%arg0: i32, %arg1: i32, %arg2: memref<8x128xf32, #tpu.memory_space<vmem>>, %arg3: memref<8x128xf32, #tpu.memory_space<vmem>>, %arg4: memref<8x128xf32, #tpu.memory_space<vmem>>, %arg5: memref<8x128xf32, #tpu.memory_space<vmem>>, %arg6: memref<8x1xf32, #tpu.memory_space<vmem>>, %arg7: memref<8x1xf32, #tpu.memory_space<vmem>>, %arg8: memref<8x1xf32, #tpu.memory_space<vmem>>) attributes {dimension_semantics = [#tpu.dimension_semantics<parallel>, #tpu.dimension_semantics<arbitrary>], iteration_bounds = array<i64: 1, 1>, scalar_prefetch = 0 : i64, scratch_operands = 2 : i64, tpu.core_type = #tpu.core_type<tc>, window_params = [{transform_indices = @transform_0, window_bounds = array<i64: 8, 128>}, {transform_indices = @transform_1, window_bounds = array<i64: 8, 128>}, {transform_indices = @transform_2, window_bounds = array<i64: 8, 128>}, {transform_indices = @transform_3, window_bounds = array<i64: 8, 128>}, {transform_indices = @transform_4, window_bounds = array<i64: 8, 1>}]} {
    %c0 = arith.constant 0 : index
    %c0_0 = arith.constant 0 : index
    %0 = vector.load %arg2[%c0, %c0_0] : memref<8x128xf32, #tpu.memory_space<vmem>>, vector<8x128xf32>
    %1 = arith.mulf %0, %0 : vector<8x128xf32>
    %cst = arith.constant dense<0.000000e+00> : vector<8xf32>
    %2 = vector.multi_reduction <add>, %1, %cst [1] : vector<8x128xf32> to vector<8xf32>
    %3 = vector.shape_cast %2 : vector<8xf32> to vector<8x1xf32>
    %cst_1 = arith.constant 1.000000e-24 : f32
    %4 = vector.broadcast %cst_1 : f32 to vector<8x1xf32>
    %5 = arith.maximumf %3, %4 : vector<8x1xf32>
    %6 = math.rsqrt %5 : vector<8x1xf32>
    %7 = vector.broadcast %6 : vector<8x1xf32> to vector<8x128xf32>
    %8 = arith.mulf %0, %7 : vector<8x128xf32>
    %c0_2 = arith.constant 0 : index
    %c0_3 = arith.constant 0 : index
    %9 = vector.load %arg3[%c0_2, %c0_3] : memref<8x128xf32, #tpu.memory_space<vmem>>, vector<8x128xf32>
    %10 = arith.mulf %9, %9 : vector<8x128xf32>
    %cst_4 = arith.constant dense<0.000000e+00> : vector<8xf32>
    %11 = vector.multi_reduction <add>, %10, %cst_4 [1] : vector<8x128xf32> to vector<8xf32>
    %12 = vector.shape_cast %11 : vector<8xf32> to vector<8x1xf32>
    %cst_5 = arith.constant 1.000000e-24 : f32
    %13 = vector.broadcast %cst_5 : f32 to vector<8x1xf32>
    %14 = arith.maximumf %12, %13 : vector<8x1xf32>
    %15 = math.rsqrt %14 : vector<8x1xf32>
    %16 = vector.broadcast %15 : vector<8x1xf32> to vector<8x128xf32>
    %17 = arith.mulf %9, %16 : vector<8x128xf32>
    %c0_6 = arith.constant 0 : index
    %c0_7 = arith.constant 0 : index
    %18 = vector.load %arg4[%c0_6, %c0_7] : memref<8x128xf32, #tpu.memory_space<vmem>>, vector<8x128xf32>
    %19 = arith.mulf %18, %18 : vector<8x128xf32>
    %cst_8 = arith.constant dense<0.000000e+00> : vector<8xf32>
    %20 = vector.multi_reduction <add>, %19, %cst_8 [1] : vector<8x128xf32> to vector<8xf32>
    %21 = vector.shape_cast %20 : vector<8xf32> to vector<8x1xf32>
    %cst_9 = arith.constant 1.000000e-24 : f32
    %22 = vector.broadcast %cst_9 : f32 to vector<8x1xf32>
    %23 = arith.maximumf %21, %22 : vector<8x1xf32>
    %24 = math.rsqrt %23 : vector<8x1xf32>
    %25 = vector.broadcast %24 : vector<8x1xf32> to vector<8x128xf32>
    %26 = arith.mulf %18, %25 : vector<8x128xf32>
    %c0_10 = arith.constant 0 : index
    %c0_11 = arith.constant 0 : index
    %27 = vector.load %arg5[%c0_10, %c0_11] : memref<8x128xf32, #tpu.memory_space<vmem>>, vector<8x128xf32>
    %28 = arith.mulf %27, %27 : vector<8x128xf32>
    %cst_12 = arith.constant dense<0.000000e+00> : vector<8xf32>
    %29 = vector.multi_reduction <add>, %28, %cst_12 [1] : vector<8x128xf32> to vector<8xf32>
    %30 = vector.shape_cast %29 : vector<8xf32> to vector<8x1xf32>
    %cst_13 = arith.constant 1.000000e-24 : f32
    %31 = vector.broadcast %cst_13 : f32 to vector<8x1xf32>
    %32 = arith.maximumf %30, %31 : vector<8x1xf32>
    %33 = math.rsqrt %32 : vector<8x1xf32>
    %34 = vector.broadcast %33 : vector<8x1xf32> to vector<8x128xf32>
    %35 = arith.mulf %27, %34 : vector<8x128xf32>
    %cst_14 = arith.constant dense<0.000000e+00> : vector<8x8xf32>
    %36 = tpu.matmul %8, %26, %cst_14 {dimension_numbers = #tpu.dot_dimension_numbers<[1], [1], [0], [0], [0, 0, 1, 0], [], []>} : vector<8x128xf32>, vector<8x128xf32>, vector<8x8xf32> -> vector<8x8xf32>
    %cst_15 = arith.constant 2.000000e+00 : f32
    %37 = vector.broadcast %cst_15 : f32 to vector<8x8xf32>
    %38 = arith.mulf %36, %37 : vector<8x8xf32>
    %39 = math.exp %38 : vector<8x8xf32>
    %cst_16 = arith.constant dense<0.000000e+00> : vector<8x8xf32>
    %40 = tpu.matmul %8, %35, %cst_16 {dimension_numbers = #tpu.dot_dimension_numbers<[1], [1], [0], [0], [0, 0, 1, 0], [], []>} : vector<8x128xf32>, vector<8x128xf32>, vector<8x8xf32> -> vector<8x8xf32>
    %cst_17 = arith.constant 2.000000e+00 : f32
    %41 = vector.broadcast %cst_17 : f32 to vector<8x8xf32>
    %42 = arith.mulf %40, %41 : vector<8x8xf32>
    %43 = math.exp %42 : vector<8x8xf32>
    %44 = arith.addf %39, %43 : vector<8x8xf32>
    %cst_18 = arith.constant dense<0.000000e+00> : vector<8x8xf32>
    %45 = tpu.matmul %17, %26, %cst_18 {dimension_numbers = #tpu.dot_dimension_numbers<[1], [1], [0], [0], [0, 0, 1, 0], [], []>} : vector<8x128xf32>, vector<8x128xf32>, vector<8x8xf32> -> vector<8x8xf32>
    %cst_19 = arith.constant 2.000000e+00 : f32
    %46 = vector.broadcast %cst_19 : f32 to vector<8x8xf32>
    %47 = arith.mulf %45, %46 : vector<8x8xf32>
    %48 = math.exp %47 : vector<8x8xf32>
    %cst_20 = arith.constant dense<0.000000e+00> : vector<8x8xf32>
    %49 = tpu.matmul %17, %35, %cst_20 {dimension_numbers = #tpu.dot_dimension_numbers<[1], [1], [0], [0], [0, 0, 1, 0], [], []>} : vector<8x128xf32>, vector<8x128xf32>, vector<8x8xf32> -> vector<8x8xf32>
    %cst_21 = arith.constant 2.000000e+00 : f32
    %50 = vector.broadcast %cst_21 : f32 to vector<8x8xf32>
    %51 = arith.mulf %49, %50 : vector<8x8xf32>
    %52 = math.exp %51 : vector<8x8xf32>
    %53 = arith.addf %48, %52 : vector<8x8xf32>
    %c0_i32 = arith.constant 0 : i32
    %54 = arith.cmpi eq, %arg1, %c0_i32 : i32
    %55 = arith.extui %54 : i1 to i32
    %c0_i32_22 = arith.constant 0 : i32
    %56 = arith.cmpi ne, %55, %c0_i32_22 : i32
    scf.if %56 {
      %cst_35 = arith.constant 0.000000e+00 : f32
      %70 = vector.broadcast %cst_35 : f32 to vector<8x1xf32>
      %c0_36 = arith.constant 0 : index
      %c0_37 = arith.constant 0 : index
      %71 = vector.load %arg7[%c0_36, %c0_37] : memref<8x1xf32, #tpu.memory_space<vmem>>, vector<8x1xf32>
      tpu.vector_store %arg7[%c0_36, %c0_37], %70 {strides = array<i32>} : memref<8x1xf32, #tpu.memory_space<vmem>>, vector<8x1xf32>,
      %cst_38 = arith.constant 0.000000e+00 : f32
      %72 = vector.broadcast %cst_38 : f32 to vector<8x1xf32>
      %c0_39 = arith.constant 0 : index
      %c0_40 = arith.constant 0 : index
      %73 = vector.load %arg8[%c0_39, %c0_40] : memref<8x1xf32, #tpu.memory_space<vmem>>, vector<8x1xf32>
      tpu.vector_store %arg8[%c0_39, %c0_40], %72 {strides = array<i32>} : memref<8x1xf32, #tpu.memory_space<vmem>>, vector<8x1xf32>,
    } else {
    }
    %c0_23 = arith.constant 0 : index
    %c0_24 = arith.constant 0 : index
    %57 = vector.load %arg7[%c0_23, %c0_24] : memref<8x1xf32, #tpu.memory_space<vmem>>, vector<8x1xf32>
    %cst_25 = arith.constant dense<0.000000e+00> : vector<8xf32>
    %58 = vector.multi_reduction <add>, %44, %cst_25 [1] : vector<8x8xf32> to vector<8xf32>
    %59 = vector.shape_cast %58 : vector<8xf32> to vector<8x1xf32>
    %60 = arith.addf %57, %59 : vector<8x1xf32>
    %c0_26 = arith.constant 0 : index
    %c0_27 = arith.constant 0 : index
    %61 = vector.load %arg7[%c0_26, %c0_27] : memref<8x1xf32, #tpu.memory_space<vmem>>, vector<8x1xf32>
    tpu.vector_store %arg7[%c0_26, %c0_27], %60 {strides = array<i32>} : memref<8x1xf32, #tpu.memory_space<vmem>>, vector<8x1xf32>,
    %c0_28 = arith.constant 0 : index
    %c0_29 = arith.constant 0 : index
    %62 = vector.load %arg8[%c0_28, %c0_29] : memref<8x1xf32, #tpu.memory_space<vmem>>, vector<8x1xf32>
    %cst_30 = arith.constant dense<0.000000e+00> : vector<8xf32>
    %63 = vector.multi_reduction <add>, %53, %cst_30 [1] : vector<8x8xf32> to vector<8xf32>
    %64 = vector.shape_cast %63 : vector<8xf32> to vector<8x1xf32>
    %65 = arith.addf %62, %64 : vector<8x1xf32>
    %c0_31 = arith.constant 0 : index
    %c0_32 = arith.constant 0 : index
    %66 = vector.load %arg8[%c0_31, %c0_32] : memref<8x1xf32, #tpu.memory_space<vmem>>, vector<8x1xf32>
    tpu.vector_store %arg8[%c0_31, %c0_32], %65 {strides = array<i32>} : memref<8x1xf32, #tpu.memory_space<vmem>>, vector<8x1xf32>,
    %c0_i32_33 = arith.constant 0 : i32
    %67 = arith.cmpi eq, %arg1, %c0_i32_33 : i32
    %68 = arith.extui %67 : i1 to i32
    %c0_i32_34 = arith.constant 0 : i32
    %69 = arith.cmpi ne, %68, %c0_i32_34 : i32
    scf.if %69 {
      %70 = arith.mulf %8, %17 : vector<8x128xf32>
      %cst_35 = arith.constant dense<0.000000e+00> : vector<8xf32>
      %71 = vector.multi_reduction <add>, %70, %cst_35 [1] : vector<8x128xf32> to vector<8xf32>
      %72 = vector.shape_cast %71 : vector<8xf32> to vector<8x1xf32>
      %73 = arith.mulf %8, %8 : vector<8x128xf32>
      %cst_36 = arith.constant dense<0.000000e+00> : vector<8xf32>
      %74 = vector.multi_reduction <add>, %73, %cst_36 [1] : vector<8x128xf32> to vector<8xf32>
      %75 = vector.shape_cast %74 : vector<8xf32> to vector<8x1xf32>
      %76 = arith.mulf %17, %17 : vector<8x128xf32>
      %cst_37 = arith.constant dense<0.000000e+00> : vector<8xf32>
      %77 = vector.multi_reduction <add>, %76, %cst_37 [1] : vector<8x128xf32> to vector<8xf32>
      %78 = vector.shape_cast %77 : vector<8xf32> to vector<8x1xf32>
      %c0_38 = arith.constant 0 : index
      %c0_39 = arith.constant 0 : index
      %79 = vector.load %arg7[%c0_38, %c0_39] : memref<8x1xf32, #tpu.memory_space<vmem>>, vector<8x1xf32>
      %cst_40 = arith.constant 2.000000e+00 : f32
      %80 = vector.broadcast %cst_40 : f32 to vector<8x1xf32>
      %81 = arith.mulf %75, %80 : vector<8x1xf32>
      %82 = math.exp %81 : vector<8x1xf32>
      %83 = arith.subf %79, %82 : vector<8x1xf32>
      %c0_41 = arith.constant 0 : index
      %c0_42 = arith.constant 0 : index
      %84 = vector.load %arg8[%c0_41, %c0_42] : memref<8x1xf32, #tpu.memory_space<vmem>>, vector<8x1xf32>
      %cst_43 = arith.constant 2.000000e+00 : f32
      %85 = vector.broadcast %cst_43 : f32 to vector<8x1xf32>
      %86 = arith.mulf %78, %85 : vector<8x1xf32>
      %87 = math.exp %86 : vector<8x1xf32>
      %88 = arith.subf %84, %87 : vector<8x1xf32>
      %89 = math.log %83 : vector<8x1xf32>
      %90 = math.log %88 : vector<8x1xf32>
      %91 = arith.addf %89, %90 : vector<8x1xf32>
      %cst_44 = arith.constant 2.000000e+00 : f32
      %92 = vector.broadcast %cst_44 : f32 to vector<8x1xf32>
      %93 = arith.mulf %92, %72 : vector<8x1xf32>
      %cst_45 = arith.constant 2.000000e+00 : f32
      %94 = vector.broadcast %cst_45 : f32 to vector<8x1xf32>
      %95 = arith.mulf %93, %94 : vector<8x1xf32>
      %96 = arith.subf %91, %95 : vector<8x1xf32>
      %c0_46 = arith.constant 0 : index
      %c0_47 = arith.constant 0 : index
      %97 = vector.load %arg6[%c0_46, %c0_47] : memref<8x1xf32, #tpu.memory_space<vmem>>, vector<8x1xf32>
      tpu.vector_store %arg6[%c0_46, %c0_47], %96 {strides = array<i32>} : memref<8x1xf32, #tpu.memory_space<vmem>>, vector<8x1xf32>,
    } else {
    }
    return
  }
  func.func @transform_0(%arg0: i32, %arg1: i32) -> (i32, i32) {
    %c0_i32 = arith.constant 0 : i32
    %c0_i32_0 = arith.constant 0 : i32
    return %arg0, %c0_i32 : i32, i32
  }
  func.func @transform_1(%arg0: i32, %arg1: i32) -> (i32, i32) {
    %c0_i32 = arith.constant 0 : i32
    %c0_i32_0 = arith.constant 0 : i32
    return %arg0, %c0_i32 : i32, i32
  }
  func.func @transform_2(%arg0: i32, %arg1: i32) -> (i32, i32) {
    %c0_i32 = arith.constant 0 : i32
    %c0_i32_0 = arith.constant 0 : i32
    return %arg1, %c0_i32 : i32, i32
  }
  func.func @transform_3(%arg0: i32, %arg1: i32) -> (i32, i32) {
    %c0_i32 = arith.constant 0 : i32
    %c0_i32_0 = arith.constant 0 : i32
    return %arg1, %c0_i32 : i32, i32
  }
  func.func @transform_4(%arg0: i32, %arg1: i32) -> (i32, i32) {
    %c0_i32 = arith.constant 0 : i32
    %c0_i32_0 = arith.constant 0 : i32
    return %arg0, %c0_i32 : i32, i32
  }
}

</mosaic_0001>

<bundles_post_ra>
// kernel: tpu_custom_call.1
= control target key start
LH: loop header
LB: loop body
LE: loop exit
PB: predicated region body
PF: predicated region fallthrough
CT: control target
= control target key end

     0   :  { %9 = vsyncpa [#allocation5], 0  ;;  %s480_s0 = inlined_call_operand.hbm [shape: f32[8,128], index: 0, kind: input, shape index: {}]   ;;  %s481_s1 = inlined_call_operand.hbm [shape: f32[8,128], index: 1, kind: input, shape index: {}]   ;;  %s482_s2 = inlined_call_operand.hbm [shape: f32[8,128], index: 2, kind: input, shape index: {}]   ;;  %s483_s3 = inlined_call_operand.hbm [shape: f32[8,128], index: 3, kind: input, shape index: {}]   ;;  %s484_s4 = inlined_call_operand.vmem [shape: f32[8,1], index: 4, kind: output, shape index: {}]  }
   0x1   :  { %10 = vsyncpa [#allocation7], 0  ;;  %s28_s17 = sshll.u32 %s481_s1, 4  ;;  %s29_s17 = int_to_ptr.hbm [resolvable:$true] %s28_s17 }
   0x2   :  { %11 = vsyncpa [#allocation10], 0  ;;  %s420_s18 = smov [#allocation6]   ;;  %s17_s22 = sshll.u32 %s480_s0, 4  ;;  %s18_s22 = int_to_ptr.hbm [resolvable:$true] %s17_s22 }
   0x3   :  { %s30_s19 = sshll.u32 %s420_s18, 4  ;;  %s421_s23 = smov [#allocation4]   ;;  %s31_s19 = int_to_ptr.vmem [resolvable:$true] %s30_s19 }
   0x4   :  { %33 = dma.hbm_to_vmem [thread:$0]  %s29_s17, 128, %s31_s19, [#allocation7]  }
   0x5   :  { %s19_s24 = sshll.u32 %s421_s23, 4  ;;  %s39_s27 = sshll.u32 %s482_s2, 4  ;;  %s20_s24 = int_to_ptr.vmem [resolvable:$true] %s19_s24  ;;  %s40_s27 = int_to_ptr.hbm [resolvable:$true] %s39_s27 }
   0x6   :  { %22 = dma.hbm_to_vmem [thread:$0]  %s18_s22, 128, %s20_s24, [#allocation5]  }
   0x7   :  { %s50_s29 = sshll.u32 %s483_s3, 4  ;;  %s422_s30 = smov [#allocation8]   ;;  %s51_s29 = int_to_ptr.hbm [resolvable:$true] %s50_s29 }
   0x8   :  { %s41_s5 = sshll.u32 %s422_s30, 4  ;;  %s423_s0 = smov [#allocation9]   ;;  %s42_s5 = int_to_ptr.vmem [resolvable:$true] %s41_s5 }
   0x9   :  { %44 = dma.hbm_to_vmem [thread:$0]  %s40_s27, 128, %s42_s5, [#allocation7]  }
   0xa   :  { %s52_s6 = sshll.u32 %s423_s0, 4  ;;  %s53_s6 = int_to_ptr.vmem [resolvable:$true] %s52_s6 }
   0xb   :  { %55 = dma.hbm_to_vmem [thread:$0]  %s51_s29, 128, %s53_s6, [#allocation10]  }
   0xc   :  { %414 = dma.done.wait [#allocation5], 128  }
   0xd   :  { %415 = vsyncadd [#allocation5], 4294967168 }
   0xe   :  { %416 = dma.done.wait [#allocation7], 256  }
   0xf   :  { %417 = vsyncadd [#allocation7], 4294967040 }
  0x10   :  { %418 = dma.done.wait [#allocation10], 128  }
  0x11   :  { %419 = vsyncadd [#allocation10], 4294967168  ;;  %v104_v0 = vld [vmem:[#allocation8] sm:$0xff]  ;;  %v88_v1 = vld [vmem:[#allocation6] sm:$0xff]  ;;  %vm234_vm12 = vcmask 7168   ;;  %v424_v51 = vmov 0.0  }
  0x12   :  { %v105_v2 = vmul.f32 %v104_v0, %v104_v0  ;;  %v89_v3 = vmul.f32 %v88_v1, %v88_v1  ;;  %v462_v4 = vld [vmem:[#allocation9] sm:$0xff]  ;;  %v464_v5 = vld [vmem:[#allocation4] sm:$0xff]  ;;  %235 = vst.msk [vmem:[#allocation2] sm:$0xff] %vm234_vm12, %v424_v51  ;;  %vm238_vm13 = vcmask 64512  }
  0x13   :  { %v121_v6 = vmul.f32 %v462_v4, %v462_v4  ;;  %v73_v7 = vmul.f32 %v464_v5, %v464_v5  ;;  %236 = vst.msk [vmem:[#allocation3] sm:$0xff] %vm234_vm12, %v424_v51 }
  0x14   :  { %106 = vadd.xlane.f32.xlu0 %v105_v2  ;;  %90 = vadd.xlane.f32.xlu1 %v89_v3 }
  0x1c   :  { %122 = vadd.xlane.f32.xlu0 %v121_v6  ;;  %74 = vadd.xlane.f32.xlu1 %v73_v7 }
  0x87   :  { %v107_v8 = vpop.xlane.xlu0 %106  ;;  %v91_v9 = vpop.xlane.xlu1 %90 }
  0x88   :  { %v108_v10 = vmax.f32 %v107_v8, 1e-24  ;;  %v92_v11 = vmax.f32 %v91_v9, 1e-24 }
  0x8a   :  { %294 = vrsqrt.f32 %v108_v10  ;;  %vm99_vm1 = vweird.f32 %v92_v11  ;;  %vm115_vm3 = vweird.f32 %v108_v10 }
  0x8b   :  { %296 = vrsqrt.f32 %v92_v11 }
  0x8f   :  { %v123_v12 = vpop.xlane.xlu0 %122  ;;  %v75_v13 = vpop.xlane.xlu1 %74 }
  0x90   :  { %v295_v14 = vpop.eup %294  ;;  %v124_v15 = vmax.f32 %v123_v12, 1e-24  ;;  %v76_v16 = vmax.f32 %v75_v13, 1e-24 }
  0x91   :  { %v297_v17 = vpop.eup %296  ;;  %v110_v18 = vmul.f32 %v295_v14, %v108_v10  ;;  %vm116_vm0 = vweird.f32 %v295_v14  ;;  %v237_v10 = vld [vmem:[#allocation2] sm:$0xff] }
  0x92   :  { %v94_v19 = vmul.f32 %v297_v17, %v92_v11  ;;  %298 = vrsqrt.f32 %v124_v15  ;;  %vm100_vm2 = vweird.f32 %v297_v17  ;;  %vm117_vm4 = vmor %vm115_vm3, %vm116_vm0  ;;  %vm83_vm7 = vweird.f32 %v76_v16 }
  0x93   :  { %v111_v20 = vmul.f32 %v295_v14, %v110_v18  ;;  %300 = vrsqrt.f32 %v76_v16  ;;  %vm101_vm5 = vmor %vm99_vm1, %vm100_vm2  ;;  %vm131_vm9 = vweird.f32 %v124_v15 }
  0x94   :  { %v95_v21 = vmul.f32 %v297_v17, %v94_v19 }
  0x95   :  { %v112_v22 = vmul.f32 0.5, %v111_v20 }
  0x96   :  { %v96_v23 = vmul.f32 0.5, %v95_v21 }
  0x97   :  { %v113_v24 = vsub.f32 1.5, %v112_v22 }
  0x98   :  { %v299_v25 = vpop.eup %298  ;;  %v97_v26 = vsub.f32 1.5, %v96_v23 }
  0x99   :  { %v301_v27 = vpop.eup %300  ;;  %v126_v28 = vmul.f32 %v299_v25, %v124_v15  ;;  %v114_v29 = vmul.f32 %v295_v14, %v113_v24  ;;  %vm132_vm6 = vweird.f32 %v299_v25 }
  0x9a   :  { %v98_v30 = vmul.f32 %v297_v17, %v97_v26  ;;  %v78_v31 = vmul.f32 %v301_v27, %v76_v16  ;;  %vm84_vm8 = vweird.f32 %v301_v27  ;;  %vm133_vm10 = vmor %vm131_vm9, %vm132_vm6  ;;  %v245_v16 = vld [vmem:[#allocation3] sm:$0xff] }
  0x9b   :  { %v127_v32 = vmul.f32 %v299_v25, %v126_v28  ;;  %v118_v33 = vsel %vm117_vm4, %v295_v14, %v114_v29  ;;  %vm85_vm11 = vmor %vm83_vm7, %vm84_vm8 }
  0x9c   :  { %v102_v34 = vsel %vm101_vm5, %v297_v17, %v98_v30  ;;  %v79_v35 = vmul.f32 %v301_v27, %v78_v31  ;;  %v119_v36 = vmul.f32 %v118_v33, %v104_v0 }
  0x9d   :  { %v128_v37 = vmul.f32 0.5, %v127_v32  ;;  %v103_v40 = vmul.f32 %v102_v34, %v88_v1 }
  0x9e   :  { %v80_v38 = vmul.f32 0.5, %v79_v35  ;;  %151 = vmatpush.xpose.msra.mxu0 %v119_v36  ;;  %198 = vmatpush.xpose.msra.mxu2 %v119_v36 }
  0x9f   :  { %v129_v39 = vsub.f32 1.5, %v128_v37  ;;  %v260_v49 = vmul.f32 %v103_v40, %v103_v40 }
  0xa0   :  { %v81_v41 = vsub.f32 1.5, %v80_v38 }
  0xa1   :  { %199 = vmatmul.f32.vlgmr.msra.gmra.mxu2 %v103_v40  ;;  %v130_v42 = vmul.f32 %v299_v25, %v129_v39 }
  0xa2   :  { %v82_v43 = vmul.f32 %v301_v27, %v81_v41 }
  0xa3   :  { %v134_v44 = vsel %vm133_vm10, %v299_v25, %v130_v42 }
  0xa4   :  { %v86_v45 = vsel %vm85_vm11, %v301_v27, %v82_v43  ;;  %v135_v46 = vmul.f32 %v134_v44, %v462_v4 }
  0xa5   :  { %v87_v47 = vmul.f32 %v86_v45, %v464_v5 }
  0xa6   :  { %174 = vmatpush.xpose.msra.mxu1 %v135_v46  ;;  %221 = vmatpush.xpose.msra.mxu3 %v135_v46 }
  0xa7   :  { %152 = vmatmul.f32.vlgmr.msra.gmra.mxu0 %v87_v47  ;;  %v257_v48 = vmul.f32 %v87_v47, %v87_v47  ;;  %v254_v50 = vmul.f32 %v103_v40, %v87_v47 }
  0xa9   :  { %258 = vadd.xlane.f32.xlu2 %v257_v48  ;;  %175 = vmatmul.f32.vlgmr.msra.gmra.mxu1 %v87_v47 }
  0xaa   :  { %222 = vmatmul.f32.vlgmr.msra.gmra.mxu3 %v103_v40 }
  0xb1   :  { %261 = vadd.xlane.f32.xlu2 %v260_v49 }
  0xb9   :  { %255 = vadd.xlane.f32.xlu2 %v254_v50 }
 0x11c   :  { %v259_v8 = vpop.xlane.xlu2 %258 }
 0x11d   :  { %v264_v9 = vmul.f32 2.0, %v259_v8 }
 0x11f   :  { %v265_v14 = vmul.f32 1.442695, %v264_v9 }
 0x124   :  { %v153_v52 = vpop.f32.mrf.mxu0  ;;  %v200_v54 = vpop.f32.mrf.mxu2 }
 0x125   :  { %v156_v53 = vmul.f32 2.0, %v153_v52  ;;  %v203_v58 = vmul.f32 2.0, %v200_v54  ;;  %v262_v11 = vpop.xlane.xlu2 %261 }
 0x126   :  { %v176_v55 = vpop.f32.mrf.mxu1  ;;  %v269_v15 = vmul.f32 2.0, %v262_v11 }
 0x127   :  { %v157_v56 = vmul.f32 1.442695, %v156_v53  ;;  %v179_v57 = vmul.f32 2.0, %v176_v55  ;;  %v204_v60 = vmul.f32 1.442695, %v203_v58 }
 0x128   :  { %v270_v17 = vmul.f32 1.442695, %v269_v15 }
 0x129   :  { %v180_v59 = vmul.f32 1.442695, %v179_v57  ;;  %302 = vpow2.f32 %v157_v56 }
 0x12b   :  { %304 = vpow2.f32 %v180_v59 }
 0x12c   :  { %306 = vpow2.f32 %v204_v60 }
 0x12d   :  { %v223_v61 = vpop.f32.mrf.mxu3  ;;  %v256_v26 = vpop.xlane.xlu2 %255 }
 0x12e   :  { %v226_v62 = vmul.f32 2.0, %v223_v61  ;;  %v278_v28 = vmul.f32 2.0, %v256_v26 }
 0x12f   :  { %v303_v0 = vpop.eup %302 }
 0x130   :  { %v227_v63 = vmul.f32 1.442695, %v226_v62  ;;  %v279_v32 = vmul.f32 2.0, %v278_v28 }
 0x131   :  { %v305_v1 = vpop.eup %304 }
 0x132   :  { %308 = vpow2.f32 %v227_v63  ;;  %v182_v2 = vadd.f32 %v305_v1, %v303_v0  ;;  %v307_v4 = vpop.eup %306 }
 0x133   :  { %310 = vpow2.f32 %v265_v14 }
 0x134   :  { %v239_v3 = vsel %vm238_vm13, %v182_v2, 0.0  ;;  %312 = vpow2.f32 %v270_v17 }
 0x135   :  { %240 = vadd.xlane.f32.xlu0 %v239_v3 }
 0x138   :  { %v309_v5 = vpop.eup %308 }
 0x139   :  { %v229_v6 = vadd.f32 %v309_v5, %v307_v4  ;;  %v311_v21 = vpop.eup %310 }
 0x13a   :  { %v313_v23 = vpop.eup %312 }
 0x13b   :  { %v246_v7 = vsel %vm238_vm13, %v229_v6, 0.0 }
 0x13c   :  { %247 = vadd.xlane.f32.xlu1 %v246_v7 }
 0x1a8   :  { %v241_v12 = vpop.xlane.xlu0 %240 }
 0x1a9   :  { %v242_v13 = vadd.f32 %v241_v12, %v237_v10 }
 0x1ab   :  { %244 = vst.msk [vmem:[#allocation2] sm:$0xff] %vm234_vm12, %v242_v13 }
 0x1af   :  { %v248_v18 = vpop.xlane.xlu1 %247 }
 0x1b0   :  { %v249_v19 = vadd.f32 %v248_v18, %v245_v16 }
 0x1b2   :  { %250 = vst.msk [vmem:[#allocation3] sm:$0xff] %vm234_vm12, %v249_v19  ;;  %v263_v20 = vld [vmem:[#allocation2] sm:$0xff] }
 0x1b3   :  { %v267_v22 = vsub.f32 %v263_v20, %v311_v21 }
 0x1b5   :  { %314 = vlog2.f32 %v267_v22 }
 0x1b9   :  { %v268_v24 = vld [vmem:[#allocation3] sm:$0xff] }
 0x1ba   :  { %v272_v25 = vsub.f32 %v268_v24, %v313_v23 }
 0x1bb   :  { %v315_v27 = vpop.eup %314 }
 0x1bc   :  { %316 = vlog2.f32 %v272_v25  ;;  %v274_v30 = vmul.f32 0.6931472, %v315_v27 }
 0x1c2   :  { %v317_v29 = vpop.eup %316 }
 0x1c3   :  { %v276_v31 = vmul.f32 0.6931472, %v317_v29 }
 0x1c5   :  { %v277_v33 = vadd.f32 %v276_v31, %v274_v30 }
 0x1c7   :  { %v280_v34 = vsub.f32 %v277_v33, %v279_v32 }
 0x1c9   :  { %281 = vst.msk [vmem:[%s484_s4] sm:$0xff] %vm234_vm12, %v280_v34 }
 0x1ca   :  { %286 = vsyncpa [#allocation5], 1 }
 0x1cb   :  { %287 = vsyncpa [#allocation7], 1 }
 0x1cc   :  { %288 = vsyncpa [#allocation10], 1 }

</bundles_post_ra>
